<compile_context>
chip_gen: v5e
topology: v5e:2x2
jax: 0.10.0
libtpu: 0.0.40
codegen_flags: <defaults>
</compile_context>

<pallas_src>
import functools

import jax
import jax.numpy as jnp
from jax.experimental import pallas as pl
from jax.experimental.pallas import tpu as pltpu

_HALO = 128                      # lane-aligned right halo; supports K <= 129.
_VMEM_BUDGET = 28 * 1024 * 1024  # target working-set size for TL selection.


def _round_up(x, m):
    return ((x + m - 1) // m) * m


def _estimate_vmem_bytes(tl, c_in, c_out, K, fuse, out_bytes, in_bytes=2):
    """Rough per-step VMEM footprint (weights + 2x pipeline bufs + temps)."""
    weights = c_out * K * c_in * in_bytes + c_out * 4
    pipeline = 2 * (c_in * tl * in_bytes          # main tile
                    + c_in * _HALO * in_bytes     # halo tile
                    + c_out * tl * out_bytes)     # output tile
    temps = c_in * (tl + _HALO) * in_bytes + c_out * tl * 4  # concat + f32 acc
    if fuse:
        temps += K * c_in * tl * in_bytes                    # x_stack
    return weights + pipeline + temps


def _choose_tl(L_out, c_in, c_out, K, fuse, out_bytes, tl_max):
    cap = max(128, (tl_max // 128) * 128)
    tl = min(cap, _round_up(L_out, 128))
    while tl > 128 and _estimate_vmem_bytes(tl, c_in, c_out, K, fuse,
                                            out_bytes) > _VMEM_BUDGET:
        tl -= 128
    return max(tl, 128)


def _conv1d_ncl_kernel(x_ref, xh_ref, w_ref, b_ref, o_ref, *, K, TL, fuse):
    """One (batch, L-tile) step of Conv1d in NCL layout.

    x_ref : (1, C_in, TL)       main input tile (compute dtype)
    xh_ref: (1, C_in, _HALO)    right halo (first lanes of the next tile)
    w_ref : (C_out, K*C_in) if fuse else (K, C_out, C_in)
    b_ref : (C_out, 1)          float32 bias
    o_ref : (1, C_out, TL)      output tile
    """
    # (C_in, TL + _HALO) window; the halo boundary is 128-aligned so this is a
    # plain lane-contiguous copy.
    x = jnp.concatenate([x_ref[0], xh_ref[0]], axis=-1)

    if fuse:
        # Fold the K taps into one fat contraction.  Each x[:, k:k+TL] is a
        # static lane shift handled by the XLU, overlapping with MXU work.
        x_stack = jnp.concatenate([x[:, k:k + TL] for k in range(K)], axis=0)
        acc = jnp.dot(w_ref[...], x_stack, preferred_element_type=jnp.float32)
    else:
        acc = jnp.dot(w_ref[0], x[:, :TL], preferred_element_type=jnp.float32)
        for k in range(1, K):
            acc = acc + jnp.dot(w_ref[k], x[:, k:k + TL],
                                preferred_element_type=jnp.float32)

    o_ref[0] = (acc + b_ref[...]).astype(o_ref.dtype)


def conv_norm_forward(signal_ncl, weight_ocik, bias_o, *, stride=1, dilation=1,
                      padding=None, compute_dtype=jnp.bfloat16, tl_max=2048):
    """Forward pass of ConvNorm. signal_ncl: (B, C_in, L) like torch Conv1d."""
    # TODO(synk): only stride=1, dilation=1 (the ConvNorm defaults) are
    # implemented in the kernel hot path.
    assert stride == 1 and dilation == 1
    c_out, c_in, K = weight_ocik.shape
    if padding is None:
        assert K % 2 == 1
        padding = (K - 1) // 2
    assert K - 1 <= _HALO, "kernel_size must be <= 129 for the 128-lane halo"

    B, _, L = signal_ncl.shape
    L_out = L + 2 * padding - (K - 1)
    out_dtype = signal_ncl.dtype
    out_bytes = jnp.dtype(out_dtype).itemsize

    # Fold taps into one contraction when channels are small relative to the
    # MXU's 256-deep contraction; keep K separate dots for wide layers.
    fuse = c_in < 256

    # Length tile: multiple of 128 (lane-dense output stores), sized so the
    # per-step working set fits comfortably in VMEM (incl. v7x's 64 MiB).
    TL = _choose_tl(L_out, c_in, c_out, K, fuse, out_bytes, tl_max)
    NT = pl.cdiv(L_out, TL)
    L_src = NT * TL + _HALO

    # Single pad pass along the contiguous length axis (doubles as the bf16
    # cast), so all kernel HBM reads are compute_dtype in native NCL.
    x_src = jnp.pad(signal_ncl.astype(compute_dtype),
                    ((0, 0), (0, 0), (padding, L_src - L - padding)))

    if fuse:
        # w_flat[o, k*C_in + c] = weight[o, c, k]  (matches x_stack ordering).
        w_arg = jnp.transpose(weight_ocik, (0, 2, 1)).reshape(c_out, K * c_in)
        w_spec = pl.BlockSpec((c_out, K * c_in), lambda b, l: (0, 0))
    else:
        w_arg = jnp.transpose(weight_ocik, (2, 0, 1))       # (K, C_out, C_in)
        w_spec = pl.BlockSpec((K, c_out, c_in), lambda b, l: (0, 0, 0))
    w_arg = w_arg.astype(compute_dtype)
    b_arg = bias_o.reshape(c_out, 1).astype(jnp.float32)

    kernel = functools.partial(_conv1d_ncl_kernel, K=K, TL=TL, fuse=fuse)
    halo_blocks_per_tile = TL // _HALO

    in_bytes = jnp.dtype(compute_dtype).itemsize
    cost = pl.CostEstimate(
        flops=2 * B * c_out * c_in * K * L_out,
        transcendentals=0,
        bytes_accessed=int(B * c_in * L_src * in_bytes
                           + c_out * c_in * K * in_bytes
                           + B * c_out * NT * TL * out_bytes),
    )

    out_pad = pl.pallas_call(
        kernel,
        out_shape=jax.ShapeDtypeStruct((B, c_out, NT * TL), out_dtype),
        grid_spec=pltpu.PrefetchScalarGridSpec(
            num_scalar_prefetch=0,
            grid=(B, NT),
            in_specs=[
                # Main TL-wide tile of the padded input.
                pl.BlockSpec((1, c_in, TL), lambda b, l: (b, 0, l)),
                # 128-lane right halo (start of the next tile), same array.
                pl.BlockSpec((1, c_in, _HALO),
                             lambda b, l: (b, 0, (l + 1) * halo_blocks_per_tile)),
                # Weights / bias: constant index maps -> resident in VMEM.
                w_spec,
                pl.BlockSpec((c_out, 1), lambda b, l: (0, 0)),
            ],
            out_specs=pl.BlockSpec((1, c_out, TL), lambda b, l: (b, 0, l)),
        ),
        compiler_params=pltpu.CompilerParams(
            dimension_semantics=("parallel", "parallel"),
            vmem_limit_bytes=48 * 1024 * 1024),
        cost_estimate=cost,
    )(x_src, x_src, w_arg, b_arg)

    # TODO(synk): add a C_out grid axis for very wide layers (C_out >~ 1024) so
    # the f32 accumulator stays small; not needed for typical ConvNorm sizes.
    if NT * TL != L_out:
        out_pad = out_pad[:, :, :L_out]
    return out_pad


def init_conv_norm_params(key, in_channels, out_channels, kernel_size,
                          gain=1.0):
    """Deterministic xavier_uniform weight (gain for 'linear' = 1.0) + bias."""
    wkey, bkey = jax.random.split(key)
    fan_in = in_channels * kernel_size
    fan_out = out_channels * kernel_size
    limit = gain * jnp.sqrt(6.0 / (fan_in + fan_out))
    weight = jax.random.uniform(
        wkey, (out_channels, in_channels, kernel_size),
        minval=-limit, maxval=limit, dtype=jnp.float32)
    # PyTorch Conv1d default bias init: U(-1/sqrt(fan_in), 1/sqrt(fan_in)).
    b_lim = 1.0 / jnp.sqrt(fan_in)
    bias = jax.random.uniform(
        bkey, (out_channels,), minval=-b_lim, maxval=b_lim, dtype=jnp.float32)
    return weight, bias


def _reference_conv(signal, weight, bias, padding, compute_dtype):
    # Same semantics as torch Conv1d, with operands rounded to the kernel's
    # MXU compute dtype and f32 accumulation (apples-to-apples comparison).
    return jax.lax.conv_general_dilated(
        signal.astype(compute_dtype), weight.astype(compute_dtype),
        window_strides=(1,), padding=[(padding, padding)],
        dimension_numbers=("NCH", "OIH", "NCH"),
        preferred_element_type=jnp.float32,
    ) + bias[None, :, None]


if __name__ == "__main__":
    key = jax.random.PRNGKey(0)
    k_x1, k_p1, k_x2, k_p2, k_x3, k_p3 = jax.random.split(key, 6)

    # Config 1: small channels -> fused-tap (single contraction) path.
    B, C_in, L, C_out, K = 2, 4, 16, 8, 3
    signal = jax.random.normal(k_x1, (B, C_in, L), dtype=jnp.float32)
    weight, bias = init_conv_norm_params(k_p1, C_in, C_out, K, gain=1.0)
    out = jax.block_until_ready(conv_norm_forward(signal, weight, bias))
    ref = _reference_conv(signal, weight, bias, (K - 1) // 2, jnp.bfloat16)
    assert out.shape == (B, C_out, L), out.shape
    assert jnp.allclose(out, ref, atol=2e-3, rtol=2e-3)

    # Config 2: wide channels -> per-tap dot path.
    B2, C_in2, L2, C_out2, K2 = 1, 256, 40, 128, 5
    signal2 = jax.random.normal(k_x2, (B2, C_in2, L2), dtype=jnp.float32)
    weight2, bias2 = init_conv_norm_params(k_p2, C_in2, C_out2, K2, gain=1.0)
    out2 = jax.block_until_ready(conv_norm_forward(signal2, weight2, bias2))
    ref2 = _reference_conv(signal2, weight2, bias2, (K2 - 1) // 2, jnp.bfloat16)
    assert out2.shape == (B2, C_out2, L2), out2.shape
    assert jnp.allclose(out2, ref2, atol=2e-3, rtol=2e-3)

    # Config 3: multi-tile length (exercises the cross-tile halo path).
    B3, C_in3, L3, C_out3, K3 = 1, 16, 300, 16, 5
    signal3 = jax.random.normal(k_x3, (B3, C_in3, L3), dtype=jnp.float32)
    weight3, bias3 = init_conv_norm_params(k_p3, C_in3, C_out3, K3, gain=1.0)
    out3 = jax.block_until_ready(
        conv_norm_forward(signal3, weight3, bias3, tl_max=128))
    ref3 = _reference_conv(signal3, weight3, bias3, (K3 - 1) // 2, jnp.bfloat16)
    assert out3.shape == (B3, C_out3, L3), out3.shape
    assert jnp.allclose(out3, ref3, atol=2e-3, rtol=2e-3)

    print("KERNEL_OK")
</pallas_src>

<mosaic_0001>
module attributes {stable_mosaic.version = 11 : i64} {
  func.func @_conv1d_ncl_kernel(%arg0: i32, %arg1: i32, %arg2: memref<1x4x128xbf16, #tpu.memory_space<vmem>>, %arg3: memref<1x4x128xbf16, #tpu.memory_space<vmem>>, %arg4: memref<8x12xbf16, #tpu.memory_space<vmem>>, %arg5: memref<8x1xf32, #tpu.memory_space<vmem>>, %arg6: memref<1x8x128xf32, #tpu.memory_space<vmem>>) attributes {dimension_semantics = [#tpu.dimension_semantics<parallel>, #tpu.dimension_semantics<parallel>], iteration_bounds = array<i64: 2, 1>, scalar_prefetch = 0 : i64, scratch_operands = 0 : i64, tpu.core_type = #tpu.core_type<tc>, window_params = [{transform_indices = @transform_0, window_bounds = array<i64: 1, 4, 128>}, {transform_indices = @transform_1, window_bounds = array<i64: 1, 4, 128>}, {pipeline_mode = #tpu.pipeline_mode<synchronous>, transform_indices = @transform_2, window_bounds = array<i64: 8, 12>}, {pipeline_mode = #tpu.pipeline_mode<synchronous>, transform_indices = @transform_3, window_bounds = array<i64: 8, 1>}, {transform_indices = @transform_4, window_bounds = array<i64: 1, 8, 128>}]} {
    %c0 = arith.constant 0 : index
    %c0_0 = arith.constant 0 : index
    %c0_1 = arith.constant 0 : index
    %0 = vector.load %arg2[%c0, %c0_0, %c0_1] : memref<1x4x128xbf16, #tpu.memory_space<vmem>>, vector<1x4x128xbf16>
    %1 = vector.shape_cast %0 : vector<1x4x128xbf16> to vector<4x128xbf16>
    %c0_2 = arith.constant 0 : index
    %c0_3 = arith.constant 0 : index
    %c0_4 = arith.constant 0 : index
    %2 = vector.load %arg3[%c0_2, %c0_3, %c0_4] : memref<1x4x128xbf16, #tpu.memory_space<vmem>>, vector<1x4x128xbf16>
    %3 = vector.shape_cast %2 : vector<1x4x128xbf16> to vector<4x128xbf16>
    %4 = tpu.concatenate %1, %3 in 1 : vector<4x128xbf16>, vector<4x128xbf16> -> vector<4x256xbf16>
    %5 = vector.extract_strided_slice %4 {offsets = [0, 0], sizes = [4, 128], strides = [1, 1]} : vector<4x256xbf16> to vector<4x128xbf16>
    %6 = vector.extract_strided_slice %4 {offsets = [0, 1], sizes = [4, 128], strides = [1, 1]} : vector<4x256xbf16> to vector<4x128xbf16>
    %7 = vector.extract_strided_slice %4 {offsets = [0, 2], sizes = [4, 128], strides = [1, 1]} : vector<4x256xbf16> to vector<4x128xbf16>
    %8 = tpu.concatenate %5, %6, %7 in 0 : vector<4x128xbf16>, vector<4x128xbf16>, vector<4x128xbf16> -> vector<12x128xbf16>
    %c0_5 = arith.constant 0 : index
    %c0_6 = arith.constant 0 : index
    %9 = vector.load %arg4[%c0_5, %c0_6] : memref<8x12xbf16, #tpu.memory_space<vmem>>, vector<8x12xbf16>
    %cst = arith.constant dense<0.000000e+00> : vector<8x128xf32>
    %10 = tpu.matmul %9, %8, %cst {dimension_numbers = #tpu.dot_dimension_numbers<[1], [0], [0], [1], [0, 0, 1, 1], [], []>} : vector<8x12xbf16>, vector<12x128xbf16>, vector<8x128xf32> -> vector<8x128xf32>
    %c0_7 = arith.constant 0 : index
    %c0_8 = arith.constant 0 : index
    %11 = vector.load %arg5[%c0_7, %c0_8] : memref<8x1xf32, #tpu.memory_space<vmem>>, vector<8x1xf32>
    %12 = vector.broadcast %11 : vector<8x1xf32> to vector<8x128xf32>
    %13 = arith.addf %10, %12 : vector<8x128xf32>
    %c0_9 = arith.constant 0 : index
    %c0_10 = arith.constant 0 : index
    %c0_11 = arith.constant 0 : index
    %14 = vector.load %arg6[%c0_9, %c0_10, %c0_11] : memref<1x8x128xf32, #tpu.memory_space<vmem>>, vector<1x8x128xf32>
    %15 = vector.shape_cast %14 : vector<1x8x128xf32> to vector<8x128xf32>
    %16 = vector.shape_cast %13 : vector<8x128xf32> to vector<1x8x128xf32>
    tpu.vector_store %arg6[%c0_9, %c0_10, %c0_11], %16 {strides = array<i32>} : memref<1x8x128xf32, #tpu.memory_space<vmem>>, vector<1x8x128xf32>,
    return
  }
  func.func @transform_0(%arg0: i32, %arg1: i32) -> (i32, i32, i32) {
    %c0_i32 = arith.constant 0 : i32
    %c0_i32_0 = arith.constant 0 : i32
    return %arg0, %c0_i32, %arg1 : i32, i32, i32
  }
  func.func @transform_1(%arg0: i32, %arg1: i32) -> (i32, i32, i32) {
    %c1_i32 = arith.constant 1 : i32
    %0 = arith.addi %arg1, %c1_i32 : i32
    %c1_i32_0 = arith.constant 1 : i32
    %1 = arith.muli %0, %c1_i32_0 : i32
    %c0_i32 = arith.constant 0 : i32
    %c0_i32_1 = arith.constant 0 : i32
    return %arg0, %c0_i32, %1 : i32, i32, i32
  }
  func.func @transform_2(%arg0: i32, %arg1: i32) -> (i32, i32) {
    %c0_i32 = arith.constant 0 : i32
    %c0_i32_0 = arith.constant 0 : i32
    %c0_i32_1 = arith.constant 0 : i32
    return %c0_i32, %c0_i32_0 : i32, i32
  }
  func.func @transform_3(%arg0: i32, %arg1: i32) -> (i32, i32) {
    %c0_i32 = arith.constant 0 : i32
    %c0_i32_0 = arith.constant 0 : i32
    %c0_i32_1 = arith.constant 0 : i32
    return %c0_i32, %c0_i32_0 : i32, i32
  }
  func.func @transform_4(%arg0: i32, %arg1: i32) -> (i32, i32, i32) {
    %c0_i32 = arith.constant 0 : i32
    %c0_i32_0 = arith.constant 0 : i32
    return %arg0, %c0_i32, %arg1 : i32, i32, i32
  }
}

</mosaic_0001>

<bundles_post_ra>
// kernel: tpu_custom_call.1
= control target key start
LH: loop header
LB: loop body
LE: loop exit
PB: predicated region body
PF: predicated region fallthrough
CT: control target
= control target key end

     0   :  { %s900_s0 = inlined_call_operand.vmem [shape: bf16[2,4,256], index: 0, kind: input, shape index: {}]   ;;  %s901_s1 = inlined_call_operand.hbm [shape: bf16[2,4,256], index: 1, kind: input, shape index: {}]   ;;  %s902_s2 = inlined_call_operand.hbm [shape: bf16[8,12], index: 2, kind: input, shape index: {}]   ;;  %s903_s3 = inlined_call_operand.vmem [shape: f32[8,1], index: 3, kind: input, shape index: {}]   ;;  %s904_s4 = inlined_call_operand.hbm [shape: f32[2,8,128], index: 4, kind: output, shape index: {}]  }
   0x1   :  { %905 = sst [smem:[#allocation11_spill]] %s902_s2 }
   0x2   :  { %9 = vsyncpa [#allocation3], 0 }
   0x3   :  { %11 = vsyncpa [#allocation3 + $0x1], 0 }
   0x4   :  { %12 = vsyncpa [#allocation6], 0 }
   0x5   :  { %13 = vsyncpa [#allocation4], 0 }
   0x6   :  { %15 = vsyncpa [#allocation4 + $0x1], 0  ;;  %s742_s15 = smov 0   ;;  %s744_s16 = smov 0  }
   0x7   :  { %s746_s17 = smov 0   ;;  %s748_s18 = smov 0  }
   0x8   :  { %s750_s19 = smov 0   ;;  %s752_s20 = smov 0  }
   0x9 LB: > { %s466_s21 = sadd.s32 4294967295, %s711_s20   ;;  %s467_s22 = sadd.s32 4294967294, %s711_s20   ;;  %s711_s20 = sphi %s752_s20, %s21_s20   ;;  %s707_s19 = sphi %s750_s19, %s918_s19   ;;  %s703_s18 = sphi %s748_s18, %s917_s18   ;;  %s699_s17 = sphi %s746_s17, %s916_s17   ;;  %s695_s16 = sphi %s744_s16, %s915_s16   ;;  %s691_s15 = sphi %s742_s15, %s914_s15  }
   0xa   : > { %p85_p0 = scmp.ne.s32.totalorder %s695_s16, %s691_s15  ;;  %p776_p1 = scmp.eq.s32.totalorder %s466_s21, 0 }
   0xb   : > { %p780_p2 = scmp.eq.s32.totalorder %s466_s21, 1  ;;  %p159_p3 = scmp.eq.s32.totalorder %s467_s22, 1 }
   0xc   : > { %p786_p4 = por %p776_p1, %p85_p0  ;;  %p468_p5 = scmp.ge.s32.totalorder %s711_s20, 1 }
   0xd   : > { %p791_p6 = por %p159_p3, %p85_p0  ;;  %p166_p7 = scmp.lt.s32.totalorder %s711_s20, 3 }
   0xe   : > { %s910_s2 = sld [smem:[#allocation11_spill]]  ;;  %p470_p9 = scmp.ge.s32.totalorder %s711_s20, 2 }
   0xf   : > { %p799_p8 = pnand %p468_p5, %p166_p7  ;;  %s713_s5 = smov [#allocation5]  }
  0x10   : > { %s180_s6 = sshll.u32 %s713_s5, 4  ;;  %s33_s7 = sadd.s32 1, %s707_s19  ;;  %s181_s6 = int_to_ptr.vmem [resolvable:$true] %s180_s6 }
  0x11   : > { %p495_p10 = pneg %p799_p8  ;;  %p35_p12 = scmp.ge.s32.totalorder %s33_s7, 2 }
  0x12   : > { %s72_s8 = sadd.s32 1, %s699_s17  ;;  %p79_p13 = scmp.ne.s32.totalorder %s699_s17, %s695_s16 }
  0x13   : > { %p496_p11 = pnand %p495_p10, %p776_p1  ;;  %p80_p0 = scmp.eq.s32.totalorder %s711_s20, 0 }
  0x14   : > { %s178_s29 = sshll.u32 %s910_s2, 4  ;;  %s920_s7 = smov (%p35_p12, %s33_s7), 0  ;;  %s179_s29 = int_to_ptr.hbm [resolvable:$true] %s178_s29 }
  0x15   : > { %498 = dma.hbm_to_vmem [thread:$0]  (!%p496_p11), %s179_s29, 64, %s181_s6, [#allocation6]  }
  0x16   : > { %p815_p3 = por %p80_p0, %p79_p13  ;;  %p821_p5 = por %p780_p2, %p79_p13 }
  0x17   : > { %s67_s11 = ssub.s32 %s707_s19, %s920_s7  ;;  %p508_p7 = scmp.lt.s32.totalorder %s711_s20, 2 }
  0x18   : > { %p70_p10 = scmp.eq.s32.totalorder %s67_s11, 0  ;;  %s205_s12 = sand.u32 1, %s699_s17  }
  0x19   : > { %s471_s13 = sshll.u32 %s205_s12, 1  ;;  %s485_s21 = sshll.u32 %s707_s19, 2 }
  0x1a   : > { %s830_s14 = scalar_select %p70_p10, %s699_s17, %s72_s8  }
  0x1b   : > { %s391_s28 = scalar_lea.hbm %s901_s1, %s485_s21  ;;  %s209_s29 = scalar_lea.vmem [#allocation2], %s471_s13 }
  0x1c   : > { %s220_s5 = sshll.u32 %s209_s29, 4  ;;  %s392_s24 = scalar_lea.hbm %s391_s28, 2  ;;  %s221_s5 = int_to_ptr.vmem [resolvable:$true] %s220_s5 }
  0x1d   : > { %s218_s6 = sshll.u32 %s392_s24, 4  ;;  %p500_p2 = pnand %p508_p7, %p815_p3  ;;  %s219_s6 = int_to_ptr.hbm [resolvable:$true] %s218_s6 }
  0x1e   : > { %s206_s2 = scalar_lea.sflag [#allocation3], %s205_s12  ;;  %229 = sbr.rel (%p799_p8) target bundleno = 311 (0x137), region = 36 }
  0x1f   : > { %502 = dma.hbm_to_vmem [thread:$0]  (!%p500_p2), %s219_s6, 32, %s221_s5, %s206_s2  }
  0x20   : > { %s841_s8 = sand.u32 (!%p799_p8), 1, %s695_s16  }
  0x21   : > { %s475_s11 = sshll.u32 (!%p799_p8), %s841_s8, 1  ;;  %s232_s13 = scalar_lea.sflag (!%p799_p8), [#allocation3], %s841_s8 }
  0x22   : > { %s235_s21 = scalar_lea.vmem (!%p799_p8), [#allocation2], %s475_s11 }
  0x23   : > { %678 = dma.done.wait (%p786_p4), %s232_s13, 32  }
  0x24   : > { %680 = vsyncadd (%p786_p4), %s232_s13, 4294967264 }
  0x25   : > { %682 = dma.done.wait (%p776_p1), [#allocation6], 64  }
  0x26   : > { %684 = vsyncadd (%p776_p1), [#allocation6], 4294967232  ;;  %p274_p8 = scmp.lt.s32.totalorder %s703_s18, 1  ;;  %s714_s25 = smov 126   ;;  %v285_v3 = vld [vmem:[%s235_s21] sm:$0x3] }
  0x27   : > { %s715_s27 = smov 127   ;;  %v297_v4 = vrot.slane %v285_v3, 4  ;;  %v289_v5 = vrot.slane %v285_v3, 6  ;;  %v312_v6 = vld [vmem:[%s903_s3] sm:$0xff]  ;;  %v716_v7 = vmov 0   ;;  %vm302_vm0 = vcmask 1031168  }
  0x28   : > { %s275_s2 = scalar_select %p274_p8, %s703_s18, 1  ;;  %563 = vset.pattern.permute.xlu2 %v716_v7  ;;  %564 = vset.pattern.permute.xlu0 %v716_v7  ;;  %vm294_vm1 = vcmask 1039360   ;;  %vm304_vm2 = vcmask 1041408   ;;  %vm308_vm3 = vcmask 1043456   ;;  %vm322_vm4 = vcmask 1045504  }
  0x29   : > { %315 = vperm.xlu2 %563, %v312_v6   ;;  %v311_v17 = vld [vmem:[#allocation5] sm:$0xf]  ;;  %vm318_vm5 = vcmask 97280   ;;  %s482_s29 = sshll.u32 %s703_s18, 3  ;;  %s477_s5 = sshll.u32 %s841_s8, 3 }
  0x2a   : > { %s486_s30 = sshll.u32 %s275_s2, 2  ;;  %s351_s11 = scalar_lea.hbm %s904_s4, %s482_s29 }
  0x2b   : > { %s281_s22 = scalar_lea.vmem %s900_s0, %s486_s30  ;;  %s273_s13 = scalar_lea.vmem [#allocation7], %s477_s5 }
  0x2c   : > { %v284_v0 = vld [vmem:[%s281_s22] sm:$0x3]  ;;  %s353_s21 = sshll.u32 %s273_s13, 4  ;;  %s355_s2 = sshll.u32 %s351_s11, 4  ;;  %s354_s21 = int_to_ptr.vmem [resolvable:$true] %s353_s21  ;;  %s356_s2 = int_to_ptr.hbm [resolvable:$true] %s355_s2 }
  0x2d   : > { %v296_v1 = vrot.slane %v284_v0, 4  ;;  %v288_v2 = vrot.slane %v284_v0, 6  ;;  %s340_s30 = scalar_lea.sflag [#allocation4], %s841_s8  ;;  %s639_s9 = sshra.s32 %s356_s2, 4  ;;  %s640_s9 = int_to_ptr.hbm [resolvable:$true] %s639_s9 }
  0x2e   : > { %s641_s12 = scalar_lea.hbm %s640_s9, 8  ;;  %p646_p12 = scmp.lt.s32.totalorder %s640_s9, %s904_s4 }
  0x2f   : > { %298 = vrot.lane.b32.xlu1 %v296_v1, %s714_s25  ;;  %290 = vrot.lane.b32.xlu0 %v288_v2, %s715_s27  ;;  %p642_p1 = scmp.ne.s32.totalorder %s640_s9, %s641_s12 }
  0x31   : > { %p643_p4 = pnand %p642_p1, %p821_p5 }
  0x33   : > { %p644_p11 = pneg %p643_p4 }
  0x37   : > { %300 = vrot.lane.b32.xlu1 %v297_v4, %s714_s25  ;;  %292 = vrot.lane.b32.xlu0 %v289_v5, %s715_s27  ;;  %s645_s25 = scalar_lea.hbm %s904_s4, 16 }
  0x38   : > { %p647_p13 = scmp.lt.s32.totalorder %s645_s25, %s641_s12 }
  0x3a   : > { %p648_p0 = por %p647_p13, %p646_p12 }
  0x3c   : > { %p649_p3 = pnand %p648_p0, %p644_p11 }
  0x83   : > { %v316_v18 = vpop.permute.xlu2 %315 }
  0xa1   : > { %v299_v8 = vpop.permute.xlu1 %298  ;;  %v291_v9 = vpop.permute.xlu0 %290 }
  0xa9   : > { %v301_v10 = vpop.permute.xlu1 %300  ;;  %v293_v11 = vpop.permute.xlu0 %292 }
  0xaa   : > { %v303_v12 = vsel %vm302_vm0, %v299_v8, %v301_v10  ;;  %v295_v13 = vsel %vm294_vm1, %v291_v9, %v293_v11 }
  0xab   : > { %v307_v14 = vsel %vm304_vm2, %v284_v0, %v295_v13 }
  0xac   : > { %v310_v15 = vsel %vm308_vm3, %v307_v14, %v303_v12 }
  0xad   : > { %v323_v16 = vsel %vm322_vm4, %v310_v15, 0 }
  0xae   : > { %332 = vmatpush.bf16.msra.mxu0 %v323_v16 }
  0xb1   : > { %480 = vmatmul.msk.bf16.vlgmr.msra.gmra.mxu0 %vm318_vm5, %v311_v17 }
 0x12e   : > { %v334_v19 = vpop.f32.mrf.mxu0 }
 0x12f   : > { %v335_v20 = vadd.f32 %v334_v19, %v316_v18 }
 0x131   : > { %338 = vst [vmem:[%s273_s13] sm:$0xff] %v335_v20 }
 0x132   : > { %652 = shalt.err (!%p649_p3)
}
 0x133   : > { %493 = dma.vmem_to_hbm [thread:$0]  (%p821_p5), %s354_s21, 128, %s356_s2, %s340_s30  }
 0x136   : > { %v336_v21 = vpop.f32.mrf.mxu0 }
 0x137 PF: > { %s367_s8 = sand.u32 1, %s691_s15   ;;  %p504_p7 = pnand %p470_p9, %p791_p6 }
 0x138   : > { %s368_s28 = scalar_lea.sflag [#allocation4], %s367_s8 }
 0x139   : > { %p505_p10 = pneg %p504_p7 }
 0x13b   : > { %686 = dma.done.wait (%p505_p10), %s368_s28, 128  }
 0x13c   : > { %688 = vsyncadd (%p505_p10), %s368_s28, 4294967168  ;;  %s21_s20 = sadd.s32 1, %s711_s20   ;;  %s914_s15 = smov %s695_s16 }
 0x13d   : > { %p18_p2 = scmp.ge.s32.totalorder %s21_s20, 4   ;;  %s915_s16 = smov %s699_s17 }
 0x13e   : > { %s916_s17 = smov %s830_s14  ;;  %s917_s18 = smov %s707_s19 }
 0x13f   : > { %s918_s19 = smov %s920_s7  ;;  %20 = sbr.rel (!%p18_p2) target bundleno = 9 (0x9), region = 88 }
 0x144   :  { %374 = vsyncpa [#allocation3], 1 }
 0x145   :  { %376 = vsyncpa [#allocation3 + $0x1], 1 }
 0x146   :  { %377 = vsyncpa [#allocation6], 1 }
 0x147   :  { %378 = vsyncpa [#allocation4], 1 }
 0x148   :  { %380 = vsyncpa [#allocation4 + $0x1], 1 }

</bundles_post_ra>
